<compile_context>
chip_gen: v7x
topology: tpu7x:2x2x1
jax: 0.10.0
libtpu: 0.0.40
codegen_flags: <defaults>
</compile_context>

<pallas_src>
import functools

import jax
import jax.numpy as jnp
from jax.experimental import pallas as pl
from jax.experimental.pallas import tpu as pltpu

_ARBITRARY = getattr(pltpu, "ARBITRARY", "arbitrary")
_CORE_PARALLEL = getattr(pltpu, "CORE_PARALLEL", getattr(pltpu, "PARALLEL", "parallel"))
_PARALLEL = getattr(pltpu, "PARALLEL", "parallel")


def _loss_kernel(x_ref, t_ref, sse_out_ref, c_out_ref, sse_acc, c_acc, *,
                 tb, f, tiles_per_split, total_tiles, rows_in_last_tile,
                 needs_row_mask, may_over_assign):
    """grid = (split, batch-tile-within-split); accumulators persist along axis 1."""
    s = pl.program_id(0)
    i = pl.program_id(1)

    @pl.when(i == 0)
    def _init():
        sse_acc[...] = jnp.zeros_like(sse_acc)
        c_acc[...] = jnp.zeros_like(c_acc)

    global_tile = s * tiles_per_split + i

    def compute(masked):
        x = x_ref[...].astype(jnp.float32)                 # (tb, f)
        t = t_ref[...].astype(jnp.float32)                 # (tb, f)
        d = x - t
        if masked:
            # Only traced for the ragged last tile: static row mask.
            valid = (jax.lax.broadcasted_iota(jnp.int32, (tb, 1), 0)
                     < rows_in_last_tile)
            d = jnp.where(valid, d, 0.0)
            xs = jnp.where(valid, x, 0.0)
        else:
            xs = x

        # --- MSE partial: per-sublane f32 partials (pure VALU adds) -----------
        sq = d * d
        sse_acc[...] += jnp.sum(sq.reshape(tb // 8, 8, f), axis=0)        # (8, f)

        # --- constraint partial: row sums via MXU matvec against ones ---------
        # Every output lane carries the row sum, so the cross-lane reduce never
        # touches the XLU; the 128x over-count is divided out in the finalize.
        ones_w = jnp.ones((f, 128), jnp.float32)
        rs = jnp.dot(xs, ones_w, preferred_element_type=jnp.float32)      # (tb, 128)
        c_acc[...] += jnp.sum((rs * rs).reshape(tb // 8, 8, 128), axis=0)  # (8, 128)

    if needs_row_mask:
        # Masked body only for the last real tile; plain body strictly before it;
        # over-assigned tiles (global_tile >= total_tiles) run neither.
        pl.when(global_tile == total_tiles - 1)(functools.partial(compute, True))
        pl.when(global_tile < total_tiles - 1)(functools.partial(compute, False))
    elif may_over_assign:
        pl.when(global_tile < total_tiles)(functools.partial(compute, False))
    else:
        compute(False)

    # --- finalize: collapse sublane/lane partials once per split ---------------
    @pl.when(i == pl.num_programs(1) - 1)
    def _finalize():
        sse_out_ref[...] = jnp.sum(sse_acc[...], axis=0, keepdims=True)           # (1, f)
        c_out_ref[...] = (jnp.sum(c_acc[...], axis=(0, 1), keepdims=True)
                          * jnp.float32(1.0 / 128.0))                             # (1, 1)


def _sublane_granule(itemsize):
    return 8 if itemsize >= 4 else (16 if itemsize == 2 else 32)


def _tpu_chip_info():
    """(tensorcores_per_chip, per-core VMEM bytes) with conservative fallbacks."""
    num_cores = 1
    vmem_bytes = 64 << 20                      # conservative floor (v7x: 64 MiB/TC)
    kind = ""
    try:
        kind = jax.devices()[0].device_kind.lower()
    except Exception:
        pass
    try:
        info = pltpu.get_tpu_info()
        for attr in ("vmem_capacity_bytes", "vmem_size_bytes", "vmem_bytes"):
            v = getattr(info, attr, None)
            if isinstance(v, int) and v > 0:
                vmem_bytes = v
                break
        for attr in ("num_tensorcores", "tensorcores_per_chip",
                     "num_cores_per_chip", "num_cores"):
            v = getattr(info, attr, None)
            if isinstance(v, int) and v > 0:
                num_cores = v
                break
    except Exception:
        pass
    if "v7" in kind:
        num_cores = max(num_cores, 2)
    vmem_bytes = max(64 << 20, min(vmem_bytes, 128 << 20))
    return max(1, min(num_cores, 2)), vmem_bytes


def _pick_batch_tile(n, f, itemsize, vmem_bytes):
    """Bytes-targeted batch tile, bounded by a chip-aware VMEM budget."""
    granule = _sublane_granule(itemsize)
    # Resident bytes per tile row: 2 inputs x 2 pipeline buffers (native dtype)
    # + ~5 full-tile f32 temporaries (cast x, cast t, d, d^2, masked x)
    # + the (tb, 128) f32 MXU row-sum block.  Counting the temporaries keeps
    # bf16 / large-F inputs inside v7x's 64 MiB/TC.
    per_row = 4 * f * itemsize + 5 * f * 4 + 128 * 4
    budget = max(8 << 20, vmem_bytes // 2)          # leave half of VMEM as headroom
    tb_max = max(granule, (budget // per_row) // granule * granule)
    # Target >= 4 MiB of combined input HBM traffic per grid step so the
    # ~0.35 us per-step overhead stays small even at v7x bandwidth.
    target_bytes = 4 << 20
    tb_target = max(granule, (target_bytes // (2 * f * itemsize)) // granule * granule)
    tb = min(tb_target, tb_max)
    n_padded = -(-n // granule) * granule
    return max(granule, min(tb, n_padded))


def constraint_adapted_loss(inputs, targets, *, constraint_lambda=0.1,
                            batch_tile=None, num_splits=None):
    """Pallas implementation of Constraint_Adapted_Loss.forward."""
    assert inputs.shape == targets.shape and inputs.ndim == 2
    n, f = inputs.shape
    itemsize = inputs.dtype.itemsize
    granule = _sublane_granule(itemsize)
    num_cores, vmem_bytes = _tpu_chip_info()

    tb = batch_tile if batch_tile is not None else _pick_batch_tile(n, f, itemsize, vmem_bytes)
    assert tb % granule == 0, f"batch_tile must be a multiple of {granule} for this dtype"

    total_tiles = pl.cdiv(n, tb)
    if num_splits is None:
        num_splits = num_cores                       # 1 on v5e/v6e, 2 on v7x
    num_splits = max(1, min(num_splits, total_tiles))
    tiles_per_split = pl.cdiv(total_tiles, num_splits)
    may_over_assign = num_splits * tiles_per_split > total_tiles
    needs_row_mask = (n % tb) != 0
    rows_in_last_tile = n - (total_tiles - 1) * tb

    if may_over_assign:
        def in_index(s, i):
            # Clamp keeps the (wasted) DMA in-bounds; the kernel skips its compute.
            return (jnp.minimum(s * tiles_per_split + i, total_tiles - 1), 0)
    else:
        def in_index(s, i):
            return (s * tiles_per_split + i, 0)

    kernel = functools.partial(
        _loss_kernel, tb=tb, f=f, tiles_per_split=tiles_per_split,
        total_tiles=total_tiles, rows_in_last_tile=rows_in_last_tile,
        needs_row_mask=needs_row_mask, may_over_assign=may_over_assign)

    vmem_needed = (4 * tb * f * itemsize            # double-buffered input tiles
                   + 5 * tb * f * 4                 # f32 compute temporaries
                   + tb * 128 * 4                   # MXU row-sum block
                   + 8 * f * 4 + 8 * 128 * 4        # accumulators
                   + 2 * (f + 128) * 4)             # output blocks
    vmem_limit = int(min(max(vmem_needed + (4 << 20), 32 << 20),
                         vmem_bytes - (8 << 20)))

    cost = pl.CostEstimate(
        flops=4 * n * f + 2 * n * f * 128,
        transcendentals=0,
        bytes_accessed=2 * n * f * itemsize + num_splits * (f + 1) * 4,
    )

    def _call(split_semantics):
        return pl.pallas_call(
            kernel,
            out_shape=(jax.ShapeDtypeStruct((num_splits, 1, f), jnp.float32),
                       jax.ShapeDtypeStruct((num_splits, 1, 1), jnp.float32)),
            grid_spec=pltpu.PrefetchScalarGridSpec(
                num_scalar_prefetch=0,
                grid=(num_splits, tiles_per_split),
                in_specs=[
                    pl.BlockSpec((tb, f), in_index),
                    pl.BlockSpec((tb, f), in_index),
                ],
                out_specs=[
                    pl.BlockSpec((None, 1, f), lambda s, i: (s, 0, 0)),   # per-split SSE
                    pl.BlockSpec((None, 1, 1), lambda s, i: (s, 0, 0)),   # per-split constraint
                ],
                scratch_shapes=[
                    pltpu.VMEM((8, f), jnp.float32),     # per-sublane SSE partials
                    pltpu.VMEM((8, 128), jnp.float32),   # per-sublane constraint partials
                ],
            ),
            compiler_params=pltpu.CompilerParams(
                dimension_semantics=(split_semantics, _ARBITRARY),
                vmem_limit_bytes=vmem_limit,
            ),
            cost_estimate=cost,
        )(inputs, targets)

    if num_splits > 1 and num_cores > 1:
        try:
            sse_parts, c_parts = _call(_CORE_PARALLEL)     # shard splits across TCs (v7x)
        except Exception:
            sse_parts, c_parts = _call(_PARALLEL)          # conservative fallback
    else:
        sse_parts, c_parts = _call(_ARBITRARY)             # single-TC: plain serial loop

    # Trivial epilogue: combine per-split partials and apply the means / lambda.
    inv_n = jnp.float32(1.0 / n)
    mse = jnp.sum(sse_parts, axis=(0, 1)) * inv_n                 # (F,)
    constraint = jnp.sum(c_parts) * inv_n                         # scalar
    return mse + jnp.float32(constraint_lambda) * constraint      # (F,)


def _reference(inputs, targets, constraint_lambda=0.1):
    inputs = inputs.astype(jnp.float32)
    targets = targets.astype(jnp.float32)
    mse = jnp.mean((inputs - targets) ** 2, axis=0)
    constraint = jnp.mean(jnp.sum(inputs, axis=1) ** 2)
    return mse + constraint_lambda * constraint


if __name__ == "__main__":
    key = jax.random.PRNGKey(0)
    k1, k2, k3, k4, k5, k6 = jax.random.split(key, 6)
    LAMBDA = 0.1
    # Tolerance loose enough to cover any MXU pass configuration for the
    # ones-matvec row sums while still catching structural errors by orders
    # of magnitude.
    TOL = dict(atol=1e-3, rtol=1e-3)

    # Case 1: tiny batch, single tile, auto tile / auto split selection.
    N1, F1 = 8, 128
    x1 = jax.random.normal(k1, (N1, F1), dtype=jnp.float32)
    y1 = jax.random.normal(k2, (N1, F1), dtype=jnp.float32)
    out1 = jax.block_until_ready(
        constraint_adapted_loss(x1, y1, constraint_lambda=LAMBDA))
    ref1 = _reference(x1, y1, LAMBDA)
    assert out1.shape == (F1,)
    assert jnp.allclose(out1, ref1, **TOL), (out1, ref1)

    # Case 2: ragged batch + explicit 2-way split (last-tile mask + per-split
    # partial combine; CORE_PARALLEL only engages on chips with 2 TCs).
    N2, F2 = 200, 128
    x2 = jax.random.normal(k3, (N2, F2), dtype=jnp.float32)
    y2 = jax.random.normal(k4, (N2, F2), dtype=jnp.float32)
    out2 = jax.block_until_ready(
        constraint_adapted_loss(x2, y2, constraint_lambda=LAMBDA,
                                batch_tile=64, num_splits=2))
    ref2 = _reference(x2, y2, LAMBDA)
    assert out2.shape == (F2,)
    assert jnp.allclose(out2, ref2, **TOL), (out2, ref2)

    # Case 3: odd tile count with 2 splits -> exercises the over-assigned
    # (compute-skipped) iteration path plus the ragged last tile.
    N3, F3 = 72, 128
    x3 = jax.random.normal(k5, (N3, F3), dtype=jnp.float32)
    y3 = jax.random.normal(k6, (N3, F3), dtype=jnp.float32)
    out3 = jax.block_until_ready(
        constraint_adapted_loss(x3, y3, constraint_lambda=LAMBDA,
                                batch_tile=16, num_splits=2))
    ref3 = _reference(x3, y3, LAMBDA)
    assert out3.shape == (F3,)
    assert jnp.allclose(out3, ref3, **TOL), (out3, ref3)

    print("KERNEL_OK")
</pallas_src>

<mosaic_0001>
module attributes {stable_mosaic.version = 11 : i64} {
  func.func @_loss_kernel(%arg0: i32, %arg1: i32, %arg2: memref<8x128xf32, #tpu.memory_space<vmem>>, %arg3: memref<8x128xf32, #tpu.memory_space<vmem>>, %arg4: memref<1x1x128xf32, #tpu.memory_space<vmem>>, %arg5: memref<1x1x1xf32, #tpu.memory_space<vmem>>, %arg6: memref<8x128xf32, #tpu.memory_space<vmem>>, %arg7: memref<8x128xf32, #tpu.memory_space<vmem>>) attributes {dimension_semantics = [#tpu.dimension_semantics<arbitrary>, #tpu.dimension_semantics<arbitrary>], iteration_bounds = array<i64: 1, 1>, scalar_prefetch = 0 : i64, scratch_operands = 2 : i64, tpu.core_type = #tpu.core_type<tc>, window_params = [{transform_indices = @transform_0, window_bounds = array<i64: 8, 128>}, {transform_indices = @transform_1, window_bounds = array<i64: 8, 128>}, {transform_indices = @transform_2, window_bounds = array<i64: 1, 1, 128>}, {transform_indices = @transform_3, window_bounds = array<i64: 1, 1, 1>}]} {
    %c0_i32 = arith.constant 0 : i32
    %0 = arith.cmpi eq, %arg1, %c0_i32 : i32
    %1 = arith.extui %0 : i1 to i32
    %c0_i32_0 = arith.constant 0 : i32
    %2 = arith.cmpi ne, %1, %c0_i32_0 : i32
    scf.if %2 {
      %cst_17 = arith.constant 0.000000e+00 : f32
      %23 = vector.broadcast %cst_17 : f32 to vector<8x128xf32>
      %c0_18 = arith.constant 0 : index
      %c0_19 = arith.constant 0 : index
      %24 = vector.load %arg6[%c0_18, %c0_19] : memref<8x128xf32, #tpu.memory_space<vmem>>, vector<8x128xf32>
      tpu.vector_store %arg6[%c0_18, %c0_19], %23 {strides = array<i32>} : memref<8x128xf32, #tpu.memory_space<vmem>>, vector<8x128xf32>,
      %cst_20 = arith.constant 0.000000e+00 : f32
      %25 = vector.broadcast %cst_20 : f32 to vector<8x128xf32>
      %c0_21 = arith.constant 0 : index
      %c0_22 = arith.constant 0 : index
      %26 = vector.load %arg7[%c0_21, %c0_22] : memref<8x128xf32, #tpu.memory_space<vmem>>, vector<8x128xf32>
      tpu.vector_store %arg7[%c0_21, %c0_22], %25 {strides = array<i32>} : memref<8x128xf32, #tpu.memory_space<vmem>>, vector<8x128xf32>,
    } else {
    }
    %c0 = arith.constant 0 : index
    %c0_1 = arith.constant 0 : index
    %3 = vector.load %arg2[%c0, %c0_1] : memref<8x128xf32, #tpu.memory_space<vmem>>, vector<8x128xf32>
    %c0_2 = arith.constant 0 : index
    %c0_3 = arith.constant 0 : index
    %4 = vector.load %arg3[%c0_2, %c0_3] : memref<8x128xf32, #tpu.memory_space<vmem>>, vector<8x128xf32>
    %5 = arith.subf %3, %4 : vector<8x128xf32>
    %6 = arith.mulf %5, %5 : vector<8x128xf32>
    %c0_4 = arith.constant 0 : index
    %c0_5 = arith.constant 0 : index
    %7 = vector.load %arg6[%c0_4, %c0_5] : memref<8x128xf32, #tpu.memory_space<vmem>>, vector<8x128xf32>
    %8 = vector.shape_cast %6 : vector<8x128xf32> to vector<1x8x128xf32>
    %cst = arith.constant dense<0.000000e+00> : vector<8x128xf32>
    %9 = vector.multi_reduction <add>, %8, %cst [0] : vector<1x8x128xf32> to vector<8x128xf32>
    %10 = arith.addf %7, %9 : vector<8x128xf32>
    %c0_6 = arith.constant 0 : index
    %c0_7 = arith.constant 0 : index
    %11 = vector.load %arg6[%c0_6, %c0_7] : memref<8x128xf32, #tpu.memory_space<vmem>>, vector<8x128xf32>
    tpu.vector_store %arg6[%c0_6, %c0_7], %10 {strides = array<i32>} : memref<8x128xf32, #tpu.memory_space<vmem>>, vector<8x128xf32>,
    %cst_8 = arith.constant 1.000000e+00 : f32
    %12 = vector.broadcast %cst_8 : f32 to vector<128x128xf32>
    %cst_9 = arith.constant dense<0.000000e+00> : vector<8x128xf32>
    %13 = tpu.matmul %3, %12, %cst_9 {dimension_numbers = #tpu.dot_dimension_numbers<[1], [0], [0], [1], [0, 0, 1, 1], [], []>} : vector<8x128xf32>, vector<128x128xf32>, vector<8x128xf32> -> vector<8x128xf32>
    %c0_10 = arith.constant 0 : index
    %c0_11 = arith.constant 0 : index
    %14 = vector.load %arg7[%c0_10, %c0_11] : memref<8x128xf32, #tpu.memory_space<vmem>>, vector<8x128xf32>
    %15 = arith.mulf %13, %13 : vector<8x128xf32>
    %16 = vector.shape_cast %15 : vector<8x128xf32> to vector<1x8x128xf32>
    %cst_12 = arith.constant dense<0.000000e+00> : vector<8x128xf32>
    %17 = vector.multi_reduction <add>, %16, %cst_12 [0] : vector<1x8x128xf32> to vector<8x128xf32>
    %18 = arith.addf %14, %17 : vector<8x128xf32>
    %c0_13 = arith.constant 0 : index
    %c0_14 = arith.constant 0 : index
    %19 = vector.load %arg7[%c0_13, %c0_14] : memref<8x128xf32, #tpu.memory_space<vmem>>, vector<8x128xf32>
    tpu.vector_store %arg7[%c0_13, %c0_14], %18 {strides = array<i32>} : memref<8x128xf32, #tpu.memory_space<vmem>>, vector<8x128xf32>,
    %c0_i32_15 = arith.constant 0 : i32
    %20 = arith.cmpi eq, %arg1, %c0_i32_15 : i32
    %21 = arith.extui %20 : i1 to i32
    %c0_i32_16 = arith.constant 0 : i32
    %22 = arith.cmpi ne, %21, %c0_i32_16 : i32
    scf.if %22 {
      %c0_17 = arith.constant 0 : index
      %c0_18 = arith.constant 0 : index
      %23 = vector.load %arg6[%c0_17, %c0_18] : memref<8x128xf32, #tpu.memory_space<vmem>>, vector<8x128xf32>
      %cst_19 = arith.constant dense<0.000000e+00> : vector<128xf32>
      %24 = vector.multi_reduction <add>, %23, %cst_19 [0] : vector<8x128xf32> to vector<128xf32>
      %25 = vector.shape_cast %24 : vector<128xf32> to vector<1x128xf32>
      %c0_20 = arith.constant 0 : index
      %c0_21 = arith.constant 0 : index
      %c0_22 = arith.constant 0 : index
      %26 = vector.load %arg4[%c0_20, %c0_21, %c0_22] : memref<1x1x128xf32, #tpu.memory_space<vmem>>, vector<1x1x128xf32>
      %27 = vector.shape_cast %26 : vector<1x1x128xf32> to vector<1x128xf32>
      %28 = vector.shape_cast %25 : vector<1x128xf32> to vector<1x1x128xf32>
      tpu.vector_store %arg4[%c0_20, %c0_21, %c0_22], %28 {strides = array<i32>} : memref<1x1x128xf32, #tpu.memory_space<vmem>>, vector<1x1x128xf32>,
      %c0_23 = arith.constant 0 : index
      %c0_24 = arith.constant 0 : index
      %29 = vector.load %arg7[%c0_23, %c0_24] : memref<8x128xf32, #tpu.memory_space<vmem>>, vector<8x128xf32>
      %30 = vector.shape_cast %29 : vector<8x128xf32> to vector<1x8x128xf32>
      %cst_25 = arith.constant dense<0.000000e+00> : vector<1xf32>
      %31 = vector.multi_reduction <add>, %30, %cst_25 [1, 2] : vector<1x8x128xf32> to vector<1xf32>
      %32 = vector.shape_cast %31 : vector<1xf32> to vector<1x1x1xf32>
      %33 = vector.extract %32[0, 0, 0] : f32 from vector<1x1x1xf32>
      %34 = vector.broadcast %33 : f32 to vector<1x1xf32>
      %cst_26 = arith.constant 7.812500e-03 : f32
      %35 = vector.broadcast %cst_26 : f32 to vector<1x1xf32>
      %36 = arith.mulf %34, %35 : vector<1x1xf32>
      %c0_27 = arith.constant 0 : index
      %c0_28 = arith.constant 0 : index
      %c0_29 = arith.constant 0 : index
      %37 = vector.load %arg5[%c0_27, %c0_28, %c0_29] : memref<1x1x1xf32, #tpu.memory_space<vmem>>, vector<1x1x1xf32>
      %38 = vector.shape_cast %37 : vector<1x1x1xf32> to vector<1x1xf32>
      %39 = vector.shape_cast %36 : vector<1x1xf32> to vector<1x1x1xf32>
      tpu.vector_store %arg5[%c0_27, %c0_28, %c0_29], %39 {strides = array<i32>} : memref<1x1x1xf32, #tpu.memory_space<vmem>>, vector<1x1x1xf32>,
    } else {
    }
    return
  }
  func.func @transform_0(%arg0: i32, %arg1: i32) -> (i32, i32) {
    %c1_i32 = arith.constant 1 : i32
    %0 = arith.muli %arg0, %c1_i32 : i32
    %1 = arith.addi %0, %arg1 : i32
    %c0_i32 = arith.constant 0 : i32
    %c0_i32_0 = arith.constant 0 : i32
    return %1, %c0_i32 : i32, i32
  }
  func.func @transform_1(%arg0: i32, %arg1: i32) -> (i32, i32) {
    %c1_i32 = arith.constant 1 : i32
    %0 = arith.muli %arg0, %c1_i32 : i32
    %1 = arith.addi %0, %arg1 : i32
    %c0_i32 = arith.constant 0 : i32
    %c0_i32_0 = arith.constant 0 : i32
    return %1, %c0_i32 : i32, i32
  }
  func.func @transform_2(%arg0: i32, %arg1: i32) -> (i32, i32, i32) {
    %c0_i32 = arith.constant 0 : i32
    %c0_i32_0 = arith.constant 0 : i32
    %c0_i32_1 = arith.constant 0 : i32
    return %arg0, %c0_i32, %c0_i32_0 : i32, i32, i32
  }
  func.func @transform_3(%arg0: i32, %arg1: i32) -> (i32, i32, i32) {
    %c0_i32 = arith.constant 0 : i32
    %c0_i32_0 = arith.constant 0 : i32
    %c0_i32_1 = arith.constant 0 : i32
    return %arg0, %c0_i32, %c0_i32_0 : i32, i32, i32
  }
}

</mosaic_0001>

<bundles_post_ra>
// kernel: tpu_custom_call.1
= control target key start
LH: loop header
LB: loop body
LE: loop exit
PB: predicated region body
PF: predicated region fallthrough
CT: control target
= control target key end

     0   :  { %9 = vsyncpa [#allocation5], 0  ;;  %s441_s0 = inlined_call_operand.hbm [shape: f32[8,128], index: 0, kind: input, shape index: {}]   ;;  %s442_s1 = inlined_call_operand.hbm [shape: f32[8,128], index: 1, kind: input, shape index: {}]   ;;  %s443_s2 = inlined_call_operand.hbm [shape: f32[1,1,128], index: 2, kind: output, shape index: {0}]   ;;  %s444_s3 = inlined_call_operand.hbm [shape: f32[1,1,1], index: 3, kind: output, shape index: {1}]  }
   0x1   :  { %10 = vsyncpa [#allocation8], 0 }
   0x2   :  { %11 = vsyncpa [#allocation6], 0 }
   0x3   :  { %12 = vsyncpa [#allocation11], 0  ;;  %s365_s12 = smov [#allocation4]   ;;  %s366_s14 = smov [#allocation7]  }
   0x4   :  { %s22_s13 = sshll.u32 %s365_s12, 4  ;;  %s35_s15 = sshll.u32 %s366_s14, 4  ;;  %s23_s13 = int_to_ptr.vmem [resolvable:$true] %s22_s13  ;;  %s36_s15 = int_to_ptr.vmem [resolvable:$true] %s35_s15 }
   0x5   :  { %s269_s18 = scalar_lea.hbm %s441_s0, 128 }
   0x6   :  { %p270_p0 = scmp.ne.s32.totalorder %s441_s0, %s269_s18  ;;  %p273_p1 = scmp.lt.u32.totalorder %s269_s18, %s441_s0 }
   0x8   :  { %p275_p2 = pnand %p273_p1, %p270_p0 }
   0xa   :  { %278 = shalt.err (!%p275_p2)
}
   0xb   :  { %s279_s23 = scalar_lea.vmem %s23_s13, 128  ;;  %p284_p4 = scmp.lt.s32.totalorder %s23_s13, %s23_s13 }
   0xc   :  { %p280_p3 = scmp.ne.s32.totalorder %s23_s13, %s279_s23  ;;  %p285_p5 = scmp.lt.s32.totalorder %s279_s23, %s279_s23 }
   0xe   :  { %p286_p6 = por %p285_p5, %p284_p4 }
  0x10   :  { %p287_p7 = pnand %p286_p6, %p280_p3 }
  0x12   :  { %290 = shalt.err (!%p287_p7)
}
  0x13   :  { %25 = dma.hbm_to_vmem [thread:$0]  %s441_s0, 128, %s23_s13, [#allocation5]  }
  0x14   :  { %s291_s28 = scalar_lea.hbm %s442_s1, 128 }
  0x15   :  { %p292_p8 = scmp.ne.s32.totalorder %s442_s1, %s291_s28  ;;  %p295_p9 = scmp.lt.u32.totalorder %s291_s28, %s442_s1 }
  0x17   :  { %p297_p10 = pnand %p295_p9, %p292_p8 }
  0x19   :  { %300 = shalt.err (!%p297_p10)
}
  0x1a   :  { %s301_s6 = scalar_lea.vmem %s36_s15, 128  ;;  %p306_p12 = scmp.lt.s32.totalorder %s36_s15, %s36_s15 }
  0x1b   :  { %p302_p11 = scmp.ne.s32.totalorder %s36_s15, %s301_s6  ;;  %p307_p13 = scmp.lt.s32.totalorder %s301_s6, %s301_s6 }
  0x1d   :  { %p308_p0 = por %p307_p13, %p306_p12 }
  0x1f   :  { %p309_p1 = pnand %p308_p0, %p302_p11 }
  0x21   :  { %312 = shalt.err (!%p309_p1)
}
  0x22   :  { %38 = dma.hbm_to_vmem [thread:$0]  %s442_s1, 128, %s36_s15, [#allocation8]  }
  0x23   :  { %357 = dma.done.wait [#allocation5], 128  }
  0x24   :  { %358 = vsyncadd [#allocation5], 4294967168 }
  0x25   :  { %359 = dma.done.wait [#allocation8], 128  }
  0x26   :  { %360 = vsyncadd [#allocation8], 4294967168  ;;  %v367_v0 = vmov 0.0|0.0   ;;  %v368_v1 = vmov 1.0|1.0   ;;  %vm369_vm0 = vmmov 0  }
  0x27   :  { %243 = vmatprep.subr.bf16.mxu0 %v367_v0  ;;  %v370_v2 = vmov 0.0   ;;  %v53_v3 = vld [vmem:[#allocation4] sm:$0xff]  ;;  %v54_v7 = vld [vmem:[#allocation7] sm:$0xff]  ;;  %s371_s1 = smov [#allocation9]  }
  0x28   :  { %244 = vmatpush3.bf16.msra.mxu0 %v368_v1  ;;  %240 = vmatprep.mubr.msk.f32.mxu0 %vm369_vm0, %v370_v2  ;;  %v55_v8 = vsub.f32 %v53_v3, %v54_v7  ;;  %s167_s8 = sshll.u32 %s371_s1, 4  ;;  %s168_s8 = int_to_ptr.vmem [resolvable:$true] %s167_s8 }
  0x29   :  { %245 = vmatprep.subr.bf16.mxu0 %v367_v0  ;;  %s313_s9 = scalar_lea.vmem %s168_s8, 16  ;;  %s317_s10 = scalar_lea.vmem %s168_s8, 32 }
  0x2a   :  { %v56_v9 = vmul.f32 %v55_v8, %v55_v8  ;;  %p314_p2 = scmp.ne.s32.totalorder %s168_s8, %s313_s9  ;;  %p318_p3 = scmp.lt.s32.totalorder %s168_s8, %s168_s8 }
  0x2b   :  { %p319_p4 = scmp.lt.s32.totalorder %s317_s10, %s313_s9 }
  0x2c   :  { %246 = vmatpush3.bf16.msra.mxu0 %v368_v1  ;;  %v140_v10 = vrot.slane %v56_v9, 4 }
  0x2d   :  { %247 = vmatprep.subr.bf16.mxu0 %v367_v0  ;;  %p320_p5 = por %p319_p4, %p318_p3 }
  0x2e   :  { %v141_v11 = vadd.f32 %v140_v10, %v56_v9 }
  0x2f   :  { %p321_p6 = pnand %p320_p5, %p314_p2 }
  0x30   :  { %248 = vmatpush3.bf16.msra.mxu0 %v368_v1  ;;  %v142_v12 = vrot.slane %v141_v11, 2 }
  0x31   :  { %249 = vmatprep.subr.bf16.mxu0 %v367_v0 }
  0x32   :  { %v143_v13 = vadd.f32 %v142_v12, %v141_v11 }
  0x34   :  { %250 = vmatpush3.bf16.msra.mxu0 %v368_v1  ;;  %v144_v14 = vrot.slane %v143_v13, 1 }
  0x35   :  { %251 = vmatprep.subr.bf16.mxu0 %v367_v0 }
  0x36   :  { %v145_v15 = vadd.f32 %v144_v14, %v143_v13 }
  0x38   :  { %252 = vmatpush3.bf16.msra.mxu0 %v368_v1  ;;  %146 = vst [vmem:[#allocation9] sm:$0x1] %v145_v15 }
  0x39   :  { %253 = vmatprep.subr.bf16.mxu0 %v367_v0 }
  0x3c   :  { %254 = vmatpush3.bf16.msra.mxu0 %v368_v1 }
  0x3d   :  { %255 = vmatprep.subr.bf16.mxu0 %v367_v0 }
  0x40   :  { %256 = vmatpush3.bf16.msra.mxu0 %v368_v1 }
  0x41   :  { %257 = vmatprep.subr.bf16.mxu0 %v367_v0 }
  0x44   :  { %258 = vmatpush3.bf16.msra.mxu0 %v368_v1 }
  0x47   :  { %241 = vmatmul.mubr.f32.vlgmr.msra.gmra.mrb[0].mxu0 %v53_v3 }
 0x11a   :  { %v127_v4 = vpop.f32.mrb[0].mxu0 }
 0x11b   :  { %v242_v5 = vpop.f32.mrb[1].mxu0  ;;  %v132_v6 = vmul.f32 %v127_v4, %v127_v4 }
 0x11d   :  { %148 = vadd.xlane.f32.xlu0 %v132_v6 }
 0x11e   :  { %324 = shalt.err (!%p321_p6)
}
 0x11f   :  { %s325_s13 = scalar_lea.hbm %s443_s2, 16 }
 0x120   :  { %p326_p7 = scmp.ne.s32.totalorder %s443_s2, %s325_s13  ;;  %p329_p8 = scmp.lt.u32.totalorder %s325_s13, %s443_s2 }
 0x122   :  { %p331_p9 = pnand %p329_p8, %p326_p7 }
 0x124   :  { %334 = shalt.err (!%p331_p9)
}
 0x125   :  { %170 = dma.vmem_to_hbm [thread:$0]  %s168_s8, 16, %s443_s2, [#allocation6]   ;;  %vm159_vm1 = vcmask 0  }
 0x126   :  { %s372_s20 = smov [#allocation10]  }
 0x127   :  { %s177_s21 = sshll.u32 %s372_s20, 4  ;;  %s178_s21 = int_to_ptr.vmem [resolvable:$true] %s177_s21 }
 0x128   :  { %s335_s23 = scalar_lea.vmem %s178_s21, 16  ;;  %s339_s24 = scalar_lea.vmem %s178_s21, 32 }
 0x129   :  { %p336_p10 = scmp.ne.s32.totalorder %s178_s21, %s335_s23  ;;  %p340_p11 = scmp.lt.s32.totalorder %s178_s21, %s178_s21 }
 0x12a   :  { %p341_p12 = scmp.lt.s32.totalorder %s339_s24, %s335_s23 }
 0x12c   :  { %p342_p13 = por %p341_p12, %p340_p11 }
 0x12e   :  { %p343_p0 = pnand %p342_p13, %p336_p10 }
 0x1aa   :  { %v149_v16 = vpop.xlane.xlu0 %148 }
 0x1ab   :  { %v150_v17 = vrot.slane %v149_v16, 4 }
 0x1ad   :  { %v151_v18 = vadd.f32 %v150_v17, %v149_v16 }
 0x1af   :  { %v152_v19 = vrot.slane %v151_v18, 2 }
 0x1b1   :  { %v153_v20 = vadd.f32 %v152_v19, %v151_v18 }
 0x1b3   :  { %v154_v21 = vrot.slane %v153_v20, 1 }
 0x1b5   :  { %v155_v22 = vadd.f32 %v154_v21, %v153_v20 }
 0x1b7   :  { %259 = vpush %v155_v22 }
 0x1e8   :  { %s260_s22 = spop %259 }
 0x1e9   :  { %v157_v23 = vstv %s260_s22 }
 0x1ea   :  { %v158_v24 = vmul.f32 0.0078125, %v157_v23 }
 0x1ec   :  { %160 = vst.msk [vmem:[#allocation10] sm:$0x1] %vm159_vm1, %v158_v24 }
 0x1ed   :  { %346 = shalt.err (!%p343_p0)
}
 0x1ee   :  { %s347_s26 = scalar_lea.hbm %s444_s3, 16 }
 0x1ef   :  { %p348_p1 = scmp.ne.s32.totalorder %s444_s3, %s347_s26  ;;  %p351_p2 = scmp.lt.u32.totalorder %s347_s26, %s444_s3 }
 0x1f1   :  { %p353_p3 = pnand %p351_p2, %p348_p1 }
 0x1f3   :  { %356 = shalt.err (!%p353_p3)
}
 0x1f4   :  { %180 = dma.vmem_to_hbm [thread:$0]  %s178_s21, 16, %s444_s3, [#allocation11]  }
 0x1f5   :  { %361 = dma.done.wait [#allocation6], 16  }
 0x1f6   :  { %362 = vsyncadd [#allocation6], 4294967280 }
 0x1f7   :  { %363 = dma.done.wait [#allocation11], 16  }
 0x1f8   :  { %364 = vsyncadd [#allocation11], 4294967280 }
 0x1f9   :  { %187 = vsyncpa [#allocation5], 1 }
 0x1fa   :  { %188 = vsyncpa [#allocation8], 1 }
 0x1fb   :  { %189 = vsyncpa [#allocation6], 1 }
 0x1fc   :  { %190 = vsyncpa [#allocation11], 1 }

</bundles_post_ra>
